<compile_context>
chip_gen: v5e
topology: v5e:2x2
jax: 0.10.0
libtpu: 0.0.40
codegen_flags: <defaults>
</compile_context>

<pallas_src>
import functools

import jax
import jax.numpy as jnp
from jax.experimental import pallas as pl
from jax.experimental.pallas import tpu as pltpu


# ---------------------------------------------------------------------------
# Pallas kernel: 4 tiny matmuls + bias + ReLU over a lane-dense point tile.
# ---------------------------------------------------------------------------
def _apm_head_kernel(feat_ref, par_ref, o_ref, *, c_in, bias_col):
    # feat_ref: [c_in, T] bf16  (channels x points; points on the lane axis)
    # par_ref : [31, bias_col+1] f32 packed params (BN folded, W1 columns permuted)
    #           rows  0:18 -> W1 | 18:27 -> W2 | 27:30 -> W3 | 30 -> regressor
    #           column `bias_col` holds the bias of each row.
    # o_ref   : [1, T] f32 lane-dense logits
    x = feat_ref[...].astype(jnp.float32)                         # [c_in, T]
    P = par_ref[...]
    w1 = P[0:18, 0:c_in]
    b1 = P[0:18, bias_col:bias_col + 1]
    w2 = P[18:27, 0:18]
    b2 = P[18:27, bias_col:bias_col + 1]
    w3 = P[27:30, 0:9]
    b3 = P[27:30, bias_col:bias_col + 1]
    wr = P[30:31, 0:3]
    br = P[30:31, bias_col:bias_col + 1]

    h = jnp.maximum(jnp.dot(w1, x, preferred_element_type=jnp.float32) + b1, 0.0)  # [18,T]
    h = jnp.maximum(jnp.dot(w2, h, preferred_element_type=jnp.float32) + b2, 0.0)  # [9,T]
    h = jnp.maximum(jnp.dot(w3, h, preferred_element_type=jnp.float32) + b3, 0.0)  # [3,T]
    o = jnp.dot(wr, h, preferred_element_type=jnp.float32) + br                    # [1,T]
    o_ref[...] = o.astype(o_ref.dtype)


# ---------------------------------------------------------------------------
# Helpers (plain JAX)
# ---------------------------------------------------------------------------
def _knn_exclude_self(pf, k, chunk=512):
    """Indices of the (k-1) nearest neighbours of each point, excluding itself.

    Mirrors pointops.knnquery(k, p, p, o, o) followed by dropping column 0.
    Blocked over query chunks so peak memory is O(chunk * n), not O(n^2).
    """
    # TODO(synk): pairwise top-k search has no clean single Pallas kernel here;
    # done as blocked plain JAX.
    n, d = pf.shape
    chunk = int(min(chunk, n))
    sq = jnp.sum(pf * pf, axis=1)                                  # [n]
    n_q = ((n + chunk - 1) // chunk) * chunk
    pf_q = jnp.pad(pf, ((0, n_q - n), (0, 0)))
    sq_q = jnp.pad(sq, ((0, n_q - n),))
    col_ids = jnp.arange(n)

    def one_chunk(start):
        q = jax.lax.dynamic_slice(pf_q, (start, 0), (chunk, d))    # [chunk, d]
        qsq = jax.lax.dynamic_slice(sq_q, (start,), (chunk,))      # [chunk]
        qid = start + jnp.arange(chunk)
        d2 = qsq[:, None] + sq[None, :] - 2.0 * (q @ pf.T)         # [chunk, n]
        d2 = jnp.where(qid[:, None] == col_ids[None, :], -1.0, d2)  # self ranks first
        _, idx = jax.lax.top_k(-d2, k)                             # k nearest (self first)
        return idx[:, 1:]                                          # [chunk, k-1]

    starts = jnp.arange(0, n_q, chunk)
    idx = jax.lax.map(one_chunk, starts)                           # [n_q//chunk, chunk, k-1]
    return idx.reshape(n_q, k - 1)[:n]


def _fold_conv_bn(w, gamma, beta, mean, var, eps=1e-5):
    """Fold eval-mode BatchNorm1d into a bias-free kernel_size=1 Conv1d."""
    scale = gamma / jnp.sqrt(var + eps)                            # [c_out]
    w_f = jnp.asarray(w, jnp.float32) * scale[:, None]             # [c_out, c_in]
    b_f = (beta - mean * scale).astype(jnp.float32)                # [c_out]
    return w_f, b_f


def _choose_tile_p(n, tile_max=8192):
    """Lane-tile size.

    Grid-step overhead (~0.35 us/step) dominates the ~72 B/point of streamed
    bf16 features, so use the biggest tile that fits VMEM (<=8192 lanes is
    ~1.2 MiB double-buffered).  Only split into >=2 steps when there are enough
    points (>=4096) that a 2-TC part (v7x) benefits from sharding the
    "parallel" grid axis; never shrink below 2048 lanes for that reason alone.
    """
    n128 = ((n + 127) // 128) * 128
    if n128 <= tile_max:
        steps = 2 if n128 >= 4096 else 1
    else:
        steps = -(-n128 // tile_max)          # cdiv
    tile = -(-n128 // steps)
    return max(128, ((tile + 127) // 128) * 128)


# ---------------------------------------------------------------------------
# Forward pass
# ---------------------------------------------------------------------------
def apm_p_group_forward(p, params, *, nsample_k=12, tile_p_max=8192, knn_chunk=512):
    """p: [B, M, 3]; returns [B*M, 1] (matches APM_p_Group.forward, eval-mode BN)."""
    B, M, _ = p.shape
    n = B * M
    k1 = nsample_k - 1
    c_in = 3 * nsample_k

    pf = jnp.asarray(p, jnp.float32).reshape(n, 3)

    # KNN (blocked, plain JAX).
    idx = _knn_exclude_self(pf, nsample_k, chunk=knn_chunk)        # [n, k-1] int32

    # Neighbour gather & |diff| with the point axis kept minor (lane-dense)
    # throughout: no (n,k,3) -> (k,3,n) major-axis transpose.
    pf_t = pf.T                                                    # [3, n]
    nbr_t = jnp.take(pf_t, idx.T, axis=1)                          # [3, k-1, n]
    diff_t = jnp.abs(pf_t[:, None, :] - nbr_t)                     # [3, k-1, n]
    feat_t = jnp.concatenate([pf_t, diff_t.reshape(3 * k1, n)], axis=0)  # [c_in, n]
    # Feature row order is [p_x, p_y, p_z, dX(j=0..), dY(..), dZ(..)]; W1's
    # columns are permuted below to match, so results are identical.
    feat_t = feat_t.astype(jnp.bfloat16)                           # halve streamed HBM bytes

    # Fold eval-mode BatchNorm into the kernel_size=1 convolutions.
    w1, b1 = _fold_conv_bn(params["w1"], params["g1"], params["beta1"],
                           params["m1"], params["v1"])
    w2, b2 = _fold_conv_bn(params["w2"], params["g2"], params["beta2"],
                           params["m2"], params["v2"])
    w3, b3 = _fold_conv_bn(params["w3"], params["g3"], params["beta3"],
                           params["m3"], params["v3"])
    wr = jnp.asarray(params["wr"], jnp.float32).reshape(1, 3)
    br = jnp.asarray(params["br"], jnp.float32).reshape(1)

    # Permute W1 columns: feature row 3 + k1*c + j  <->  torch channel 3 + 3*j + c.
    perm = jnp.asarray(
        [0, 1, 2] + [3 + 3 * j + c for c in range(3) for j in range(k1)], jnp.int32)
    w1 = w1[:, perm]

    # Pack all weights/biases into ONE resident f32 block.
    bias_col = max(c_in, 18)
    pk = jnp.zeros((31, bias_col + 1), jnp.float32)
    pk = pk.at[0:18, 0:c_in].set(w1)
    pk = pk.at[0:18, bias_col].set(b1)
    pk = pk.at[18:27, 0:18].set(w2)
    pk = pk.at[18:27, bias_col].set(b2)
    pk = pk.at[27:30, 0:9].set(w3)
    pk = pk.at[27:30, bias_col].set(b3)
    pk = pk.at[30, 0:3].set(wr[0])
    pk = pk.at[30, bias_col].set(br[0])

    # Point tiling: big lane-dense tiles; pad the lane axis to a tile multiple.
    tile_p = _choose_tile_p(n, tile_p_max)
    n_pad = ((n + tile_p - 1) // tile_p) * tile_p
    if n_pad != n:
        feat_t = jnp.pad(feat_t, ((0, 0), (0, n_pad - n)))

    kernel = functools.partial(_apm_head_kernel, c_in=c_in, bias_col=bias_col)
    logits = pl.pallas_call(
        kernel,
        out_shape=jax.ShapeDtypeStruct((1, n_pad), jnp.float32),
        grid_spec=pltpu.PrefetchScalarGridSpec(
            num_scalar_prefetch=0,
            grid=(n_pad // tile_p,),
            in_specs=[
                pl.BlockSpec((c_in, tile_p), lambda i: (0, i)),        # streamed bf16 slab
                pl.BlockSpec((31, bias_col + 1), lambda i: (0, 0)),    # resident packed params
            ],
            out_specs=pl.BlockSpec((1, tile_p), lambda i: (0, i)),     # lane-dense logits
        ),
        compiler_params=pltpu.CompilerParams(
            dimension_semantics=("parallel",)),
    )(feat_t, pk)

    # Tiny epilogue in plain JAX: F.softmax with PyTorch's implicit-dim rule
    # (dim=0 for a 3-D tensor), then flatten(0, 1).  Padded lanes are sliced off
    # before the softmax.
    out = jax.nn.softmax(logits[0, :n].reshape(B, M, 1), axis=0)
    return out.reshape(n, 1)


# ---------------------------------------------------------------------------
# Pure-JAX fp32 reference of APM_p_Group.forward (eval-mode BN).
# ---------------------------------------------------------------------------
def _reference_forward(p, params, nsample_k, knn_chunk=512):
    B, M, _ = p.shape
    pf = jnp.asarray(p, jnp.float32).reshape(-1, 3)
    n = pf.shape[0]
    idx = _knn_exclude_self(pf, nsample_k, chunk=knn_chunk)
    nbr = jnp.take(pf, idx, axis=0)                                # [n, k-1, 3]
    p_ij = jnp.concatenate([pf[:, None, :], jnp.abs(pf[:, None, :] - nbr)], axis=1)
    p_ij = p_ij.reshape(n, -1)                                     # [n, 3k]
    x = p_ij.reshape(B, M, 3 * nsample_k).transpose(0, 2, 1)       # [B, 3k, M]
    eps = 1e-5
    for w, g, b, m, v in (
        (params["w1"], params["g1"], params["beta1"], params["m1"], params["v1"]),
        (params["w2"], params["g2"], params["beta2"], params["m2"], params["v2"]),
        (params["w3"], params["g3"], params["beta3"], params["m3"], params["v3"]),
    ):
        x = jnp.einsum("oc,bcp->bop", w, x)
        x = (x - m[None, :, None]) / jnp.sqrt(v + eps)[None, :, None]
        x = x * g[None, :, None] + b[None, :, None]
        x = jnp.maximum(x, 0.0)
    h = x.transpose(0, 2, 1)                                       # [B, M, 3]
    out = h @ params["wr"].T + params["br"][None, None, :]         # [B, M, 1]
    out = jax.nn.softmax(out, axis=0)                              # implicit dim=0 (3-D)
    return out.reshape(B * M, 1)


if __name__ == "__main__":
    key = jax.random.PRNGKey(0)
    ks = jax.random.split(key, 20)

    batch_size = 2
    npoints = 256          # points per batch element
    nsample_k = 12         # module default; in_channels = 3*k = 36
    p = jax.random.normal(ks[0], (batch_size, npoints, 3), dtype=jnp.float32)

    c_in = 3 * nsample_k
    params = {
        # Conv1d(36,18,1,bias=False) + BatchNorm1d(18)
        "w1": 0.2 * jax.random.normal(ks[1], (18, c_in), jnp.float32),
        "g1": 1.0 + 0.1 * jax.random.normal(ks[2], (18,), jnp.float32),
        "beta1": 0.1 * jax.random.normal(ks[3], (18,), jnp.float32),
        "m1": 0.1 * jax.random.normal(ks[4], (18,), jnp.float32),
        "v1": 0.5 + jax.random.uniform(ks[5], (18,), jnp.float32),
        # Conv1d(18,9,1,bias=False) + BatchNorm1d(9)
        "w2": 0.2 * jax.random.normal(ks[6], (9, 18), jnp.float32),
        "g2": 1.0 + 0.1 * jax.random.normal(ks[7], (9,), jnp.float32),
        "beta2": 0.1 * jax.random.normal(ks[8], (9,), jnp.float32),
        "m2": 0.1 * jax.random.normal(ks[9], (9,), jnp.float32),
        "v2": 0.5 + jax.random.uniform(ks[10], (9,), jnp.float32),
        # Conv1d(9,3,1,bias=False) + BatchNorm1d(3)
        "w3": 0.2 * jax.random.normal(ks[11], (3, 9), jnp.float32),
        "g3": 1.0 + 0.1 * jax.random.normal(ks[12], (3,), jnp.float32),
        "beta3": 0.1 * jax.random.normal(ks[13], (3,), jnp.float32),
        "m3": 0.1 * jax.random.normal(ks[14], (3,), jnp.float32),
        "v3": 0.5 + jax.random.uniform(ks[15], (3,), jnp.float32),
        # Linear(3, 1) regressor
        "wr": 0.5 * jax.random.normal(ks[16], (1, 3), jnp.float32),
        "br": 0.1 * jax.random.normal(ks[17], (1,), jnp.float32),
    }

    out = apm_p_group_forward(p, params, nsample_k=nsample_k)
    out = jax.block_until_ready(out)

    ref = _reference_forward(p, params, nsample_k)
    assert out.shape == (batch_size * npoints, 1), out.shape
    max_err = float(jnp.max(jnp.abs(out - ref)))
    # bf16 feature streaming: tolerance loosened vs a pure-fp32 reference.
    assert jnp.allclose(out, ref, atol=1e-2, rtol=1e-2), \
        f"mismatch vs reference, max_err={max_err}"

    print("KERNEL_OK")
</pallas_src>

<mosaic_0001>
module attributes {stable_mosaic.version = 11 : i64} {
  func.func @_apm_head_kernel(%arg0: i32, %arg1: memref<36x512xbf16, #tpu.memory_space<vmem>>, %arg2: memref<31x37xf32, #tpu.memory_space<vmem>>, %arg3: memref<1x512xf32, #tpu.memory_space<vmem>>) attributes {dimension_semantics = [#tpu.dimension_semantics<parallel>], iteration_bounds = array<i64: 1>, scalar_prefetch = 0 : i64, scratch_operands = 0 : i64, tpu.core_type = #tpu.core_type<tc>, window_params = [{transform_indices = @transform_0, window_bounds = array<i64: 36, 512>}, {pipeline_mode = #tpu.pipeline_mode<synchronous>, transform_indices = @transform_1, window_bounds = array<i64: 31, 37>}, {transform_indices = @transform_2, window_bounds = array<i64: 1, 512>}]} {
    %c0 = arith.constant 0 : index
    %c0_0 = arith.constant 0 : index
    %0 = vector.load %arg1[%c0, %c0_0] : memref<36x512xbf16, #tpu.memory_space<vmem>>, vector<36x512xbf16>
    %1 = arith.extf %0 : vector<36x512xbf16> to vector<36x512xf32>
    %c0_1 = arith.constant 0 : index
    %c0_2 = arith.constant 0 : index
    %2 = vector.load %arg2[%c0_1, %c0_2] : memref<31x37xf32, #tpu.memory_space<vmem>>, vector<31x37xf32>
    %3 = vector.extract_strided_slice %2 {offsets = [0, 0], sizes = [18, 36], strides = [1, 1]} : vector<31x37xf32> to vector<18x36xf32>
    %4 = vector.extract_strided_slice %2 {offsets = [0, 36], sizes = [18, 1], strides = [1, 1]} : vector<31x37xf32> to vector<18x1xf32>
    %5 = vector.extract_strided_slice %2 {offsets = [18, 0], sizes = [9, 18], strides = [1, 1]} : vector<31x37xf32> to vector<9x18xf32>
    %6 = vector.extract_strided_slice %2 {offsets = [18, 36], sizes = [9, 1], strides = [1, 1]} : vector<31x37xf32> to vector<9x1xf32>
    %7 = vector.extract_strided_slice %2 {offsets = [27, 0], sizes = [3, 9], strides = [1, 1]} : vector<31x37xf32> to vector<3x9xf32>
    %8 = vector.extract_strided_slice %2 {offsets = [27, 36], sizes = [3, 1], strides = [1, 1]} : vector<31x37xf32> to vector<3x1xf32>
    %9 = vector.extract_strided_slice %2 {offsets = [30, 0], sizes = [1, 3], strides = [1, 1]} : vector<31x37xf32> to vector<1x3xf32>
    %10 = vector.extract_strided_slice %2 {offsets = [30, 36], sizes = [1, 1], strides = [1, 1]} : vector<31x37xf32> to vector<1x1xf32>
    %cst = arith.constant dense<0.000000e+00> : vector<18x512xf32>
    %11 = tpu.matmul %3, %1, %cst {dimension_numbers = #tpu.dot_dimension_numbers<[1], [0], [0], [1], [0, 0, 1, 1], [], []>} : vector<18x36xf32>, vector<36x512xf32>, vector<18x512xf32> -> vector<18x512xf32>
    %12 = vector.broadcast %4 : vector<18x1xf32> to vector<18x512xf32>
    %13 = arith.addf %11, %12 : vector<18x512xf32>
    %cst_3 = arith.constant 0.000000e+00 : f32
    %14 = vector.broadcast %cst_3 : f32 to vector<18x512xf32>
    %15 = arith.maximumf %13, %14 : vector<18x512xf32>
    %cst_4 = arith.constant dense<0.000000e+00> : vector<9x512xf32>
    %16 = tpu.matmul %5, %15, %cst_4 {dimension_numbers = #tpu.dot_dimension_numbers<[1], [0], [0], [1], [0, 0, 1, 1], [], []>} : vector<9x18xf32>, vector<18x512xf32>, vector<9x512xf32> -> vector<9x512xf32>
    %17 = vector.broadcast %6 : vector<9x1xf32> to vector<9x512xf32>
    %18 = arith.addf %16, %17 : vector<9x512xf32>
    %cst_5 = arith.constant 0.000000e+00 : f32
    %19 = vector.broadcast %cst_5 : f32 to vector<9x512xf32>
    %20 = arith.maximumf %18, %19 : vector<9x512xf32>
    %cst_6 = arith.constant dense<0.000000e+00> : vector<3x512xf32>
    %21 = tpu.matmul %7, %20, %cst_6 {dimension_numbers = #tpu.dot_dimension_numbers<[1], [0], [0], [1], [0, 0, 1, 1], [], []>} : vector<3x9xf32>, vector<9x512xf32>, vector<3x512xf32> -> vector<3x512xf32>
    %22 = vector.broadcast %8 : vector<3x1xf32> to vector<3x512xf32>
    %23 = arith.addf %21, %22 : vector<3x512xf32>
    %cst_7 = arith.constant 0.000000e+00 : f32
    %24 = vector.broadcast %cst_7 : f32 to vector<3x512xf32>
    %25 = arith.maximumf %23, %24 : vector<3x512xf32>
    %cst_8 = arith.constant dense<0.000000e+00> : vector<1x512xf32>
    %26 = tpu.matmul %9, %25, %cst_8 {dimension_numbers = #tpu.dot_dimension_numbers<[1], [0], [0], [1], [0, 0, 1, 1], [], []>} : vector<1x3xf32>, vector<3x512xf32>, vector<1x512xf32> -> vector<1x512xf32>
    %27 = vector.broadcast %10 : vector<1x1xf32> to vector<1x512xf32>
    %28 = arith.addf %26, %27 : vector<1x512xf32>
    %c0_9 = arith.constant 0 : index
    %c0_10 = arith.constant 0 : index
    %29 = vector.load %arg3[%c0_9, %c0_10] : memref<1x512xf32, #tpu.memory_space<vmem>>, vector<1x512xf32>
    tpu.vector_store %arg3[%c0_9, %c0_10], %28 {strides = array<i32>} : memref<1x512xf32, #tpu.memory_space<vmem>>, vector<1x512xf32>,
    return
  }
  func.func @transform_0(%arg0: i32) -> (i32, i32) {
    %c0_i32 = arith.constant 0 : i32
    %c0_i32_0 = arith.constant 0 : i32
    return %c0_i32, %arg0 : i32, i32
  }
  func.func @transform_1(%arg0: i32) -> (i32, i32) {
    %c0_i32 = arith.constant 0 : i32
    %c0_i32_0 = arith.constant 0 : i32
    %c0_i32_1 = arith.constant 0 : i32
    return %c0_i32, %c0_i32_0 : i32, i32
  }
  func.func @transform_2(%arg0: i32) -> (i32, i32) {
    %c0_i32 = arith.constant 0 : i32
    %c0_i32_0 = arith.constant 0 : i32
    return %c0_i32, %arg0 : i32, i32
  }
}

</mosaic_0001>

<bundles_post_ra>
// kernel: tpu_custom_call.1
= control target key start
LH: loop header
LB: loop body
LE: loop exit
PB: predicated region body
PF: predicated region fallthrough
CT: control target
= control target key end

     0   :  { %7 = vsyncpa [#allocation3], 0  ;;  %s825_s0 = inlined_call_operand.hbm [shape: bf16[36,512], index: 0, kind: input, shape index: {}]   ;;  %s826_s1 = inlined_call_operand.hbm [shape: f32[31,37], index: 1, kind: input, shape index: {}]   ;;  %s827_s2 = inlined_call_operand.hbm [shape: f32[1,512], index: 2, kind: output, shape index: {}]  }
   0x1   :  { %8 = vsyncpa [#allocation6], 0 }
   0x2   :  { %9 = vsyncpa [#allocation4], 0  ;;  %s14_s11 = sshll.u32 %s825_s0, 4  ;;  %s729_s12 = smov [#allocation2]   ;;  %s15_s11 = int_to_ptr.hbm [resolvable:$true] %s14_s11 }
   0x3   :  { %s16_s13 = sshll.u32 %s729_s12, 4  ;;  %s27_s16 = sshll.u32 %s826_s1, 4  ;;  %s17_s13 = int_to_ptr.vmem [resolvable:$true] %s16_s13  ;;  %s28_s16 = int_to_ptr.hbm [resolvable:$true] %s27_s16 }
   0x4   :  { %s730_s17 = smov 256   ;;  %s731_s18 = smov 16  }
   0x5   :  { %22 = dma.hbm_to_vmem [thread:$0]  %s15_s11, 1280, %s17_s13, [#allocation3], %s730_s17, %s730_s17, %s731_s18  }
   0x6   :  { %s732_s19 = smov [#allocation5]   ;;  %s733_s21 = smov 128  }
   0x7   :  { %s29_s20 = sshll.u32 %s732_s19, 4  ;;  %s734_s22 = smov 8   ;;  %s30_s20 = int_to_ptr.vmem [resolvable:$true] %s29_s20 }
   0x8   :  { %35 = dma.hbm_to_vmem [thread:$0]  %s28_s16, 512, %s30_s20, [#allocation6], %s733_s21, %s733_s21, %s734_s22  }
   0x9   :  { %723 = dma.done.wait [#allocation3], 1280  }
   0xa   :  { %724 = vsyncadd [#allocation3], 4294966016 }
   0xb   :  { %725 = dma.done.wait [#allocation6], 512  }
   0xc   :  { %726 = vsyncadd [#allocation6], 4294966784  ;;  %v735_v0 = vmov 36   ;;  %v52_v1 = vld [vmem:[#allocation2 + $0x40] sm:$0x33]  ;;  %vm100_vm0 = vcmask 1043456  }
   0xd   :  { %650 = vset.pattern.permute.xlu1 %v735_v0  ;;  %649 = vset.pattern.permute.xlu0 %v735_v0  ;;  %v53_v2 = vld [vmem:[#allocation2 + $0x48] sm:$0x33]  ;;  %v50_v3 = vld [vmem:[#allocation2 + $0x30] sm:$0xff]  ;;  %v70_v4 = vunpack.c.l.bf16 %v52_v1  ;;  %v71_v5 = vunpack.c.h.bf16 %v52_v1  ;;  %v51_v8 = vld [vmem:[#allocation2 + $0x38] sm:$0xff]  ;;  %vm93_vm1 = vcmask 293888   ;;  %vm233_vm2 = vcmask 1045504  }
   0xe   :  { %v72_v6 = vunpack.c.l.bf16 %v53_v2  ;;  %v73_v7 = vunpack.c.h.bf16 %v53_v2  ;;  %v48_v9 = vld [vmem:[#allocation2 + $0x20] sm:$0xff]  ;;  %v49_v10 = vld [vmem:[#allocation2 + $0x28] sm:$0xff]  ;;  %v66_v11 = vunpack.c.l.bf16 %v50_v3  ;;  %v67_v12 = vunpack.c.h.bf16 %v50_v3  ;;  %v46_v15 = vld [vmem:[#allocation2 + $0x10] sm:$0xff]  ;;  %s736_s0 = smov [#allocation7]   ;;  %s586_s25 = sshll.u32 %s827_s2, 4  ;;  %s587_s25 = int_to_ptr.hbm [resolvable:$true] %s586_s25 }
   0xf   :  { %v68_v13 = vunpack.c.l.bf16 %v51_v8  ;;  %v69_v14 = vunpack.c.h.bf16 %v51_v8  ;;  %597 = vmatpush.msk.msra.mxu0 %vm100_vm0, %v70_v4  ;;  %601 = vmatpush.msk.msra.mxu1 %vm100_vm0, %v71_v5  ;;  %v62_v16 = vunpack.c.l.bf16 %v48_v9  ;;  %v63_v17 = vunpack.c.h.bf16 %v48_v9  ;;  %v47_v18 = vld [vmem:[#allocation2 + $0x18] sm:$0xff]  ;;  %v44_v21 = vld [vmem:[#allocation2] sm:$0xff]  ;;  %v45_v24 = vld [vmem:[#allocation2 + $0x8] sm:$0xff]  ;;  %s584_s1 = sshll.u32 %s736_s0, 4  ;;  %s585_s1 = int_to_ptr.vmem [resolvable:$true] %s584_s1 }
  0x10   :  { %605 = vmatpush.msk.msra.mxu2 %vm100_vm0, %v72_v6  ;;  %609 = vmatpush.msk.msra.mxu3 %vm100_vm0, %v73_v7  ;;  %v64_v19 = vunpack.c.l.bf16 %v49_v10  ;;  %v65_v20 = vunpack.c.h.bf16 %v49_v10  ;;  %v58_v22 = vunpack.c.l.bf16 %v46_v15  ;;  %v59_v23 = vunpack.c.h.bf16 %v46_v15  ;;  %v74_v31 = vld [vmem:[#allocation5] sm:$0xff]  ;;  %v76_v32 = vld [vmem:[#allocation5 + $0x10] sm:$0xff]  ;;  %v75_v33 = vld [vmem:[#allocation5 + $0x8] sm:$0xff] }
  0x11   :  { %125 = vmatpush.msra.mxu0 %v66_v11  ;;  %151 = vmatpush.msra.mxu1 %v67_v12  ;;  %v60_v25 = vunpack.c.l.bf16 %v47_v18  ;;  %v61_v26 = vunpack.c.h.bf16 %v47_v18  ;;  %v54_v27 = vunpack.c.l.bf16 %v44_v21  ;;  %v55_v28 = vunpack.c.h.bf16 %v44_v21  ;;  %v766_v34 = vld [vmem:[#allocation5 + $0x18] sm:$0x7f] }
  0x12   :  { %177 = vmatpush.msra.mxu2 %v68_v13  ;;  %203 = vmatpush.msra.mxu3 %v69_v14  ;;  %v56_v29 = vunpack.c.l.bf16 %v45_v24  ;;  %v57_v30 = vunpack.c.h.bf16 %v45_v24  ;;  %vm247_vm3 = vcmask 1041408   ;;  %v235_v58 = vrot.slane %v766_v34, 2 }
  0x13   :  { %126 = vmatpush.msra.mxu0 %v62_v16  ;;  %152 = vmatpush.msra.mxu1 %v63_v17  ;;  %v234_v61 = vrot.slane %v76_v32, 2  ;;  %vm242_vm4 = vcmask 146432   ;;  %vm366_vm5 = vcmask 1040384   ;;  %vm363_vm6 = vcmask 72704  }
  0x14   :  { %178 = vmatpush.msra.mxu2 %v64_v19  ;;  %204 = vmatpush.msra.mxu3 %v65_v20  ;;  %vm469_vm7 = vcmask 1042432   ;;  %vm466_vm8 = vcmask 23552   ;;  %vm570_vm9 = vcmask 1042434  }
  0x15   :  { %127 = vmatpush.msra.mxu0 %v58_v22  ;;  %153 = vmatpush.msra.mxu1 %v59_v23  ;;  %v236_v4 = vsel %vm233_vm2, %v234_v61, %v235_v58 }
  0x16   :  { %179 = vmatpush.msra.mxu2 %v60_v25  ;;  %205 = vmatpush.msra.mxu3 %v61_v26 }
  0x17   :  { %128 = vmatpush.msra.mxu0 %v54_v27  ;;  %154 = vmatpush.msra.mxu1 %v55_v28  ;;  %v360_v27 = vrot.slane %v766_v34, 3 }
  0x18   :  { %180 = vmatpush.msra.mxu2 %v56_v29  ;;  %206 = vmatpush.msra.mxu3 %v57_v30 }
  0x19   :  { %598 = vmatmul.msk.f32.vlgmr.msra.gmra.mxu0 %vm93_vm1, %v74_v31  ;;  %602 = vmatmul.msk.f32.vlgmr.msra.gmra.mxu1 %vm93_vm1, %v74_v31 }
  0x1a   :  { %606 = vmatmul.msk.f32.vlgmr.msra.gmra.mxu2 %vm93_vm1, %v74_v31  ;;  %610 = vmatmul.msk.f32.vlgmr.msra.gmra.mxu3 %vm93_vm1, %v74_v31 }
  0x1b   :  { %90 = vperm.xlu0 %649, %v76_v32   ;;  %80 = vperm.xlu1 %650, %v74_v31  }
  0x21   :  { %599 = vmatmul.msk.f32.gmra.mxu0 %vm93_vm1, %v75_v33  ;;  %603 = vmatmul.msk.f32.gmra.mxu1 %vm93_vm1, %v75_v33 }
  0x22   :  { %607 = vmatmul.msk.f32.gmra.mxu2 %vm93_vm1, %v75_v33  ;;  %611 = vmatmul.msk.f32.gmra.mxu3 %vm93_vm1, %v75_v33 }
  0x23   :  { %85 = vperm.xlu0 %649, %v75_v33   ;;  %231 = vperm.xlu1 %650, %v766_v34  }
  0x29   :  { %600 = vmatmul.msk.f32.gmra.mxu0 %vm93_vm1, %v76_v32  ;;  %604 = vmatmul.msk.f32.gmra.mxu1 %vm93_vm1, %v76_v32 }
  0x2a   :  { %608 = vmatmul.msk.f32.gmra.mxu2 %vm93_vm1, %v76_v32  ;;  %612 = vmatmul.msk.f32.gmra.mxu3 %vm93_vm1, %v76_v32 }
  0x8d   :  { %v81_v35 = vpop.permute.xlu1 %80  ;;  %v91_v36 = vpop.permute.xlu0 %90 }
  0x8e   :  { %v237_v37 = vrot.slane %v91_v36, 2 }
  0x95   :  { %v777_v38 = vpop.permute.xlu1 %231  ;;  %v86_v47 = vpop.permute.xlu0 %85 }
  0x96   :  { %v130_v39 = vpop.f32.mrf.mxu0  ;;  %v156_v40 = vpop.f32.mrf.mxu1  ;;  %v780_v41 = vrot.slane %v777_v38, 2 }
  0x97   :  { %v131_v52 = vadd.f32 %v130_v39, %v81_v35  ;;  %v157_v53 = vadd.f32 %v156_v40, %v81_v35 }
  0x98   :  { %v784_v42 = vsel %vm233_vm2, %v237_v37, %v780_v41 }
  0x99   :  { %v217_v0 = vmax.f32 %v131_v52, 0.0  ;;  %v218_v1 = vmax.f32 %v157_v53, 0.0 }
  0x9d   :  { %v182_v43 = vpop.f32.mrf.mxu2  ;;  %v208_v44 = vpop.f32.mrf.mxu3 }
  0x9e   :  { %v133_v45 = vpop.f32.mrf.mxu0  ;;  %v159_v46 = vpop.f32.mrf.mxu1  ;;  %v183_v9 = vadd.f32 %v182_v43, %v81_v35  ;;  %v209_v10 = vadd.f32 %v208_v44, %v81_v35 }
  0x9f   :  { %v134_v56 = vadd.f32 %v133_v45, %v86_v47  ;;  %v160_v57 = vadd.f32 %v159_v46, %v86_v47 }
  0xa0   :  { %v219_v15 = vmax.f32 %v183_v9, 0.0  ;;  %v220_v16 = vmax.f32 %v209_v10, 0.0 }
  0xa1   :  { %v221_v62 = vmax.f32 %v134_v56, 0.0  ;;  %v222_v63 = vmax.f32 %v160_v57, 0.0 }
  0xa5   :  { %v185_v48 = vpop.f32.mrf.mxu2  ;;  %v211_v49 = vpop.f32.mrf.mxu3 }
  0xa6   :  { %v136_v50 = vpop.f32.mrf.mxu0  ;;  %v162_v51 = vpop.f32.mrf.mxu1  ;;  %v186_v5 = vadd.f32 %v185_v48, %v86_v47  ;;  %v212_v6 = vadd.f32 %v211_v49, %v86_v47  ;;  %v463_v49 = vrot.slane %v766_v34, 6  ;;  %v464_v34 = vrot.slane %v777_v38, 6 }
  0xa7   :  { %v137_v54 = vadd.f32 %v136_v50, %v91_v36  ;;  %v163_v55 = vadd.f32 %v162_v51, %v91_v36 }
  0xa8   :  { %v223_v13 = vmax.f32 %v186_v5, 0.0  ;;  %v224_v14 = vmax.f32 %v212_v6, 0.0 }
  0xa9   :  { %v225_v59 = vmax.f32 %v137_v54, 0.0  ;;  %v226_v60 = vmax.f32 %v163_v55, 0.0 }
  0xab   :  { %613 = vmatpush.msk.msrb.mxu0 %vm247_vm3, %v225_v59  ;;  %616 = vmatpush.msk.msrb.mxu1 %vm247_vm3, %v226_v60 }
  0xad   :  { %v188_v2 = vpop.f32.mrf.mxu2  ;;  %v214_v3 = vpop.f32.mrf.mxu3  ;;  %274 = vmatpush.msrb.mxu0 %v221_v62  ;;  %297 = vmatpush.msrb.mxu1 %v222_v63  ;;  %v574_v63 = vlaneseq }
  0xae   :  { %v189_v7 = vadd.f32 %v188_v2, %v91_v36  ;;  %v215_v8 = vadd.f32 %v214_v3, %v91_v36 }
  0xaf   :  { %275 = vmatpush.msrb.mxu0 %v217_v0  ;;  %298 = vmatpush.msrb.mxu1 %v218_v1  ;;  %vm576_vm10 = vcmp.lt.s32.totalorder %v574_v63, 512 }
  0xb0   :  { %v227_v11 = vmax.f32 %v189_v7, 0.0  ;;  %v228_v12 = vmax.f32 %v215_v8, 0.0  ;;  %614 = vmatmul.msk.f32.vlgmr.msrb.gmra.mxu0 %vm242_vm4, %v236_v4  ;;  %617 = vmatmul.msk.f32.vlgmr.msrb.gmra.mxu1 %vm242_vm4, %v236_v4 }
  0xb2   :  { %619 = vmatpush.msk.msrb.mxu2 %vm247_vm3, %v227_v11  ;;  %622 = vmatpush.msk.msrb.mxu3 %vm247_vm3, %v228_v12 }
  0xb4   :  { %320 = vmatpush.msrb.mxu2 %v223_v13  ;;  %343 = vmatpush.msrb.mxu3 %v224_v14 }
  0xb6   :  { %321 = vmatpush.msrb.mxu2 %v219_v15  ;;  %344 = vmatpush.msrb.mxu3 %v220_v16 }
  0xb7   :  { %620 = vmatmul.msk.f32.vlgmr.msrb.gmra.mxu2 %vm242_vm4, %v236_v4  ;;  %623 = vmatmul.msk.f32.vlgmr.msrb.gmra.mxu3 %vm242_vm4, %v236_v4 }
  0xb8   :  { %615 = vmatmul.msk.f32.gmra.mxu0 %vm242_vm4, %v235_v58  ;;  %618 = vmatmul.msk.f32.gmra.mxu1 %vm242_vm4, %v235_v58 }
  0xbf   :  { %621 = vmatmul.msk.f32.gmra.mxu2 %vm242_vm4, %v235_v58  ;;  %624 = vmatmul.msk.f32.gmra.mxu3 %vm242_vm4, %v235_v58 }
 0x12d   :  { %v277_v17 = vpop.f32.mrf.mxu0  ;;  %v300_v18 = vpop.f32.mrf.mxu1 }
 0x12e   :  { %v278_v21 = vadd.f32 %v277_v17, %v784_v42  ;;  %v301_v22 = vadd.f32 %v300_v18, %v784_v42 }
 0x130   :  { %v352_v28 = vmax.f32 %v278_v21, 0.0  ;;  %v353_v29 = vmax.f32 %v301_v22, 0.0 }
 0x135   :  { %v280_v19 = vpop.f32.mrf.mxu0  ;;  %v303_v20 = vpop.f32.mrf.mxu1 }
 0x136   :  { %v281_v23 = vadd.f32 %v280_v19, %v780_v41  ;;  %v304_v24 = vadd.f32 %v303_v20, %v780_v41 }
 0x138   :  { %v356_v25 = vmax.f32 %v281_v23, 0.0  ;;  %v357_v26 = vmax.f32 %v304_v24, 0.0 }
 0x13a   :  { %v323_v30 = vpop.f32.mrf.mxu2  ;;  %v346_v31 = vpop.f32.mrf.mxu3  ;;  %625 = vmatpush.msk.msra.mxu0 %vm366_vm5, %v356_v25  ;;  %627 = vmatpush.msk.msra.mxu1 %vm366_vm5, %v357_v26 }
 0x13b   :  { %v324_v35 = vadd.f32 %v323_v30, %v784_v42  ;;  %v347_v36 = vadd.f32 %v346_v31, %v784_v42  ;;  %v361_v42 = vrot.slane %v777_v38, 3 }
 0x13c   :  { %394 = vmatpush.msra.mxu0 %v352_v28  ;;  %414 = vmatpush.msra.mxu1 %v353_v29 }
 0x13d   :  { %626 = vmatmul.msk.f32.vlgmr.msra.gmra.mxu0 %vm363_vm6, %v360_v27  ;;  %628 = vmatmul.msk.f32.vlgmr.msra.gmra.mxu1 %vm363_vm6, %v360_v27  ;;  %v354_v44 = vmax.f32 %v324_v35, 0.0  ;;  %v355_v45 = vmax.f32 %v347_v36, 0.0 }
 0x142   :  { %v326_v32 = vpop.f32.mrf.mxu2  ;;  %v349_v33 = vpop.f32.mrf.mxu3 }
 0x143   :  { %v327_v37 = vadd.f32 %v326_v32, %v780_v41  ;;  %v350_v39 = vadd.f32 %v349_v33, %v780_v41 }
 0x145   :  { %v358_v40 = vmax.f32 %v327_v37, 0.0  ;;  %v359_v43 = vmax.f32 %v350_v39, 0.0 }
 0x147   :  { %629 = vmatpush.msk.msra.mxu2 %vm366_vm5, %v358_v40  ;;  %631 = vmatpush.msk.msra.mxu3 %vm366_vm5, %v359_v43 }
 0x149   :  { %434 = vmatpush.msra.mxu2 %v354_v44  ;;  %454 = vmatpush.msra.mxu3 %v355_v45 }
 0x14a   :  { %630 = vmatmul.msk.f32.vlgmr.msra.gmra.mxu2 %vm363_vm6, %v360_v27  ;;  %632 = vmatmul.msk.f32.vlgmr.msra.gmra.mxu3 %vm363_vm6, %v360_v27 }
 0x1ba   :  { %v396_v46 = vpop.f32.mrf.mxu0  ;;  %v416_v47 = vpop.f32.mrf.mxu1 }
 0x1bb   :  { %v397_v48 = vadd.f32 %v396_v46, %v361_v42  ;;  %v417_v41 = vadd.f32 %v416_v47, %v361_v42 }
 0x1bd   :  { %v459_v50 = vmax.f32 %v397_v48, 0.0  ;;  %v460_v51 = vmax.f32 %v417_v41, 0.0 }
 0x1bf   :  { %633 = vmatpush.msk.msrb.mxu0 %vm469_vm7, %v459_v50  ;;  %635 = vmatpush.msk.msrb.mxu1 %vm469_vm7, %v460_v51 }
 0x1c0   :  { %634 = vmatmul.msk.f32.vlgmr.msrb.gmra.mxu0 %vm466_vm8, %v463_v49  ;;  %636 = vmatmul.msk.f32.vlgmr.msrb.gmra.mxu1 %vm466_vm8, %v463_v49 }
 0x1cd   :  { %v436_v52 = vpop.f32.mrf.mxu2  ;;  %v456_v53 = vpop.f32.mrf.mxu3 }
 0x1ce   :  { %v437_v54 = vadd.f32 %v436_v52, %v361_v42  ;;  %v457_v55 = vadd.f32 %v456_v53, %v361_v42 }
 0x1d0   :  { %v461_v56 = vmax.f32 %v437_v54, 0.0  ;;  %v462_v57 = vmax.f32 %v457_v55, 0.0 }
 0x1d2   :  { %637 = vmatpush.msk.msrb.mxu2 %vm469_vm7, %v461_v56  ;;  %639 = vmatpush.msk.msrb.mxu3 %vm469_vm7, %v462_v57 }
 0x1d3   :  { %638 = vmatmul.msk.f32.vlgmr.msrb.gmra.mxu2 %vm466_vm8, %v463_v49  ;;  %640 = vmatmul.msk.f32.vlgmr.msrb.gmra.mxu3 %vm466_vm8, %v463_v49 }
 0x23d   :  { %v519_v58 = vpop.f32.mrf.mxu1  ;;  %v499_v60 = vpop.f32.mrf.mxu0 }
 0x23e   :  { %v520_v59 = vadd.f32 %v519_v58, %v464_v34  ;;  %v500_v3 = vadd.f32 %v499_v60, %v464_v34 }
 0x240   :  { %v566_v0 = vrot.slane %v520_v59, 7 }
 0x242   :  { %v569_v38 = vsel %vm366_vm5, %v500_v3, %v566_v0 }
 0x256   :  { %v539_v61 = vpop.f32.mrf.mxu2  ;;  %v559_v62 = vpop.f32.mrf.mxu3 }
 0x257   :  { %v540_v1 = vadd.f32 %v539_v61, %v464_v34  ;;  %v560_v2 = vadd.f32 %v559_v62, %v464_v34 }
 0x259   :  { %v567_v4 = vrot.slane %v540_v1, 6  ;;  %v568_v5 = vrot.slane %v560_v2, 5 }
 0x25b   :  { %v571_v6 = vsel %vm570_vm9, %v567_v4, %v568_v5 }
 0x25c   :  { %v572_v7 = vsel %vm247_vm3, %v569_v38, %v571_v6 }
 0x25d   :  { %578 = vst.msk [vmem:[#allocation7] sm:$0xf] %vm576_vm10, %v572_v7 }
 0x25e   :  { %589 = dma.vmem_to_hbm [thread:$0]  %s585_s1, 64, %s587_s25, [#allocation4]  }
 0x25f   :  { %727 = dma.done.wait [#allocation4], 64  }
 0x260   :  { %728 = vsyncadd [#allocation4], 4294967232 }
 0x261   :  { %594 = vsyncpa [#allocation3], 1 }
 0x262   :  { %595 = vsyncpa [#allocation6], 1 }
 0x263   :  { %596 = vsyncpa [#allocation4], 1 }

</bundles_post_ra>
